<compile_context>
chip_gen: v5e
topology: v5e:2x2
jax: 0.10.0
libtpu: 0.0.40
codegen_flags: <defaults>
</compile_context>

<pallas_src>
import functools

import jax
import jax.numpy as jnp
from jax import lax
from jax.experimental import pallas as pl
from jax.experimental.pallas import tpu as pltpu


def _round_up(x, m):
    return ((x + m - 1) // m) * m


def _pick_row_tile(hw, cap=1024):
    """Largest divisor of hw that is <= cap and sublane-aligned (multiple of 8).

    Falls back to hw itself (a full-extent block is always legal). Note: at
    very large oddly-sized resolutions the fallback could create a VMEM-busting
    block; at module-consistent (even H, W) sizes it never triggers.
    """
    for t in range(min(cap, hw), 7, -1):
        if hw % t == 0 and t % 8 == 0:
            return t
    return hw


# ----------------------------------------------------------------------------
# Single fused kernel:
#   im2col-conv3x3 + bias + ReLU + global-avg-pool + batched fc head
#   + masked cross-entropy.   grid = (num_row_tiles,)   [reduction axis]
#
# The (B, CP) pooling accumulator lives in VMEM scratch and is init/finalized
# via pl.when.  Correctness relies on the single grid axis being a SEQUENTIAL
# reduction axis -- it must stay "arbitrary", never "parallel".
# ----------------------------------------------------------------------------
def fused_forward_kernel(xcol_ref, wc_ref, bc_ref, wfc_ref, bfc_ref, labels_ref,
                         logits_ref, loss_ref, pool_acc,
                         *, inv_hw, num_classes, batch):
    # xcol_ref : (B, TR, KP) bf16   wc_ref : (KP, CP) bf16   bc_ref : (1, CP) f32
    # wfc_ref  : (CP, NCP) bf16     bfc_ref: (1, NCP) f32    labels : (B, 1) i32
    # logits_ref: (B, NCP) f32      loss_ref: (1, NCP) f32   pool_acc: (B, CP) f32
    r = pl.program_id(0)

    @pl.when(r == 0)
    def _init():
        pool_acc[...] = jnp.zeros_like(pool_acc)

    # Conv as one lane-dense MXU matmul per (batch element, row tile); bf16
    # operands, f32 accumulation.  M = TR (>=256 at real sizes) fills the MXU.
    partial_sums = []
    for b in range(batch):
        xb = xcol_ref[b]                                          # (TR, KP) bf16
        acc = jnp.dot(xb, wc_ref[...],
                      preferred_element_type=jnp.float32)         # (TR, CP) f32
        acc = jnp.maximum(acc + bc_ref[...], 0.0)                 # bias + ReLU
        partial_sums.append(jnp.sum(acc, axis=0, keepdims=True))  # (1, CP)
    pool_acc[...] += jnp.concatenate(partial_sums, axis=0)        # running GAP sum

    @pl.when(r == pl.num_programs(0) - 1)
    def _finalize():
        # Batched fc head: ONE (B, CP) x (CP, NCP) matmul (bf16 in, f32 acc).
        pooled = (pool_acc[...] * inv_hw).astype(jnp.bfloat16)    # (B, CP)
        logits = jnp.dot(pooled, wfc_ref[...],
                         preferred_element_type=jnp.float32) + bfc_ref[...]
        # NOTE: padded class columns come out exactly 0 (zero-padded weights /
        # bias); any consumer of the padded logits must slice [:, :num_classes].
        logits_ref[...] = logits                                  # (B, NCP)

        # Fused cross-entropy (mean over batch); padded class columns masked.
        bsz, ncp = logits.shape
        col = lax.broadcasted_iota(jnp.int32, (bsz, ncp), 1)
        valid = col < num_classes
        masked = jnp.where(valid, logits, jnp.float32(-1e30))
        m = jnp.max(masked, axis=-1, keepdims=True)               # (B, 1)
        lse = jnp.log(jnp.sum(jnp.exp(masked - m), axis=-1, keepdims=True)) + m
        onehot = (col == labels_ref[...]).astype(jnp.float32)     # (B, ncp)
        picked = jnp.sum(logits * onehot, axis=-1, keepdims=True)  # (B, 1)
        nll = lse - picked                                        # (B, 1)
        mean_loss = jnp.sum(nll, axis=0, keepdims=True) * (1.0 / bsz)  # (1, 1)
        loss_ref[...] = jnp.broadcast_to(mean_loss, (1, ncp))     # lane-dense row


def crisis_forward_fused(x_nhwc, conv_w, conv_b, fc_w, fc_b, labels):
    """Fused forward_features stand-in + task head + CE.

    Returns (padded logits (B, NCP) f32, loss row (1, NCP) f32)."""
    B, H, W, Cin = x_nhwc.shape
    Cout = conv_w.shape[-1]
    NC = fc_w.shape[-1]
    K = 9 * Cin
    KP = _round_up(K, 32)       # NOT 128: keeps the dominant HBM slab ~zero-free
    CP = _round_up(Cout, 128)   # lane-dense feature dim
    NCP = _round_up(NC, 128)    # lane-dense class dim
    HW = H * W
    TR = _pick_row_tile(HW, cap=1024)
    R = HW // TR

    # im2col in the wrapper (layout plumbing, not compute hoisting).
    # TODO(synk): at real image sizes fold im2col into the kernel (haloed raw
    # image DMA + 9 shifted taps) to cut conv-input HBM bytes ~9x further.
    xp = jnp.pad(x_nhwc, ((0, 0), (1, 1), (1, 1), (0, 0)))
    taps = [xp[:, kh:kh + H, kw:kw + W, :] for kh in range(3) for kw in range(3)]
    xcol = jnp.concatenate(taps, axis=-1).reshape(B, HW, K)
    xcol = jnp.pad(xcol, ((0, 0), (0, 0), (0, KP - K))).astype(jnp.bfloat16)

    wc = jnp.pad(conv_w.reshape(K, Cout),
                 ((0, KP - K), (0, CP - Cout))).astype(jnp.bfloat16)
    bc = jnp.pad(conv_b, (0, CP - Cout)).reshape(1, CP).astype(jnp.float32)
    wfc = jnp.pad(fc_w, ((0, CP - Cout), (0, NCP - NC))).astype(jnp.bfloat16)
    bfc = jnp.pad(fc_b, (0, NCP - NC)).reshape(1, NCP).astype(jnp.float32)
    lab = labels.reshape(B, 1).astype(jnp.int32)

    kern = functools.partial(fused_forward_kernel, inv_hw=1.0 / HW,
                             num_classes=NC, batch=B)
    logits_pad, loss_row = pl.pallas_call(
        kern,
        out_shape=(jax.ShapeDtypeStruct((B, NCP), jnp.float32),
                   jax.ShapeDtypeStruct((1, NCP), jnp.float32)),
        grid_spec=pltpu.PrefetchScalarGridSpec(
            num_scalar_prefetch=0,
            grid=(R,),
            in_specs=[
                pl.BlockSpec((B, TR, KP), lambda r: (0, r, 0)),
                pl.BlockSpec((KP, CP), lambda r: (0, 0)),
                pl.BlockSpec((1, CP), lambda r: (0, 0)),
                pl.BlockSpec((CP, NCP), lambda r: (0, 0)),
                pl.BlockSpec((1, NCP), lambda r: (0, 0)),
                pl.BlockSpec((B, 1), lambda r: (0, 0)),
            ],
            out_specs=(pl.BlockSpec((B, NCP), lambda r: (0, 0)),
                       pl.BlockSpec((1, NCP), lambda r: (0, 0))),
            scratch_shapes=[pltpu.VMEM((B, CP), jnp.float32)],
        ),
        compiler_params=pltpu.CompilerParams(
            # Single reduction axis: must remain sequential ("arbitrary").
            dimension_semantics=("arbitrary",),
            # Non-binding at these tile sizes; when scaling up, re-derive so
            # the 2-buffered xcol block + resident weights stay under ~48 MiB
            # on v7x (64 MiB VMEM), v5e/v6e have 128 MiB headroom.
            vmem_limit_bytes=32 * 1024 * 1024,
        ),
    )(xcol, wc, bc, wfc, bfc, lab)
    return logits_pad, loss_row


# ----------------------------------------------------------------------------
# CrisisVitDs.forward(image, labels, task, train)
# ----------------------------------------------------------------------------
@functools.partial(jax.jit, static_argnames=("task", "train"))
def crisis_vit_forward(image_nchw, params, labels, task="info", train=True):
    x = jnp.transpose(image_nchw, (0, 2, 3, 1))               # NCHW -> NHWC
    fc_w, fc_b = params["heads"][task]
    nc = fc_w.shape[-1]
    logits_pad, loss_row = crisis_forward_fused(
        x, params["conv_w"], params["conv_b"], fc_w, fc_b, labels)
    if train:
        return loss_row[0, 0]
    return logits_pad[:, :nc]


# ----------------------------------------------------------------------------
# Pure-JAX (f32) reference for validation
# ----------------------------------------------------------------------------
def ref_forward(image_nchw, params, labels, task, train):
    x = jnp.transpose(image_nchw, (0, 2, 3, 1))
    out = lax.conv_general_dilated(
        x, params["conv_w"], (1, 1), "SAME",
        dimension_numbers=("NHWC", "HWIO", "NHWC")) + params["conv_b"]
    out = jnp.maximum(out, 0.0)
    pooled = out.mean(axis=(1, 2))
    fc_w, fc_b = params["heads"][task]
    logits = pooled @ fc_w + fc_b
    if not train:
        return logits
    logp = jax.nn.log_softmax(logits, axis=-1)
    return -jnp.take_along_axis(logp, labels[:, None], axis=-1).mean()


if __name__ == "__main__":
    # Small shapes consistent with the module: NCHW RGB images, hidden_size
    # shrunk 768 -> 32, the four task heads of CrisisVitDs: dt=7, info=2,
    # human=4, damage=3 classes.
    B, Cin, RES = 2, 3, 16
    HIDDEN = 32
    TASKS = {"dt": 7, "info": 2, "human": 4, "damage": 3}

    key = jax.random.PRNGKey(0)
    keys = jax.random.split(key, 3 + 2 * len(TASKS))

    image = jax.random.normal(keys[0], (B, Cin, RES, RES), jnp.float32)
    conv_w = jax.random.normal(keys[1], (3, 3, Cin, HIDDEN), jnp.float32) * 0.1
    conv_b = jax.random.normal(keys[2], (HIDDEN,), jnp.float32) * 0.1

    heads, labels = {}, {}
    for i, (task, nc) in enumerate(TASKS.items()):
        # init_weights: Linear weight ~ N(0, 0.02), bias zero.
        heads[task] = (
            jax.random.normal(keys[3 + 2 * i], (HIDDEN, nc), jnp.float32) * 0.02,
            jnp.zeros((nc,), jnp.float32),
        )
        labels[task] = jax.random.randint(keys[4 + 2 * i], (B,), 0, nc, jnp.int32)

    params = {"conv_w": conv_w, "conv_b": conv_b, "heads": heads}

    for task, nc in TASKS.items():
        # train=True -> scalar cross-entropy loss; train=False -> (B, nc) logits
        loss = crisis_vit_forward(image, params, labels[task], task=task, train=True)
        loss = jax.block_until_ready(loss)
        logits = crisis_vit_forward(image, params, labels[task], task=task, train=False)
        logits = jax.block_until_ready(logits)

        ref_loss = ref_forward(image, params, labels[task], task, True)
        ref_logits = ref_forward(image, params, labels[task], task, False)
        # bf16 MXU operands (f32 accumulation) vs the f32 reference.
        assert jnp.allclose(loss, ref_loss, atol=5e-3, rtol=1e-2), (task, loss, ref_loss)
        assert jnp.allclose(logits, ref_logits, atol=5e-3, rtol=1e-2), (task,)
        assert logits.shape == (B, nc)

    print("KERNEL_OK")
</pallas_src>

<mosaic_0001>
module attributes {stable_mosaic.version = 11 : i64} {
  func.func @fused_forward_kernel(%arg0: i32, %arg1: memref<2x256x32xbf16, #tpu.memory_space<vmem>>, %arg2: memref<32x128xbf16, #tpu.memory_space<vmem>>, %arg3: memref<1x128xf32, #tpu.memory_space<vmem>>, %arg4: memref<128x128xbf16, #tpu.memory_space<vmem>>, %arg5: memref<1x128xf32, #tpu.memory_space<vmem>>, %arg6: memref<2x1xi32, #tpu.memory_space<vmem>>, %arg7: memref<2x128xf32, #tpu.memory_space<vmem>>, %arg8: memref<1x128xf32, #tpu.memory_space<vmem>>, %arg9: memref<2x128xf32, #tpu.memory_space<vmem>>) attributes {dimension_semantics = [#tpu.dimension_semantics<arbitrary>], iteration_bounds = array<i64: 1>, scalar_prefetch = 0 : i64, scratch_operands = 1 : i64, tpu.core_type = #tpu.core_type<tc>, window_params = [{transform_indices = @transform_0, window_bounds = array<i64: 2, 256, 32>}, {pipeline_mode = #tpu.pipeline_mode<synchronous>, transform_indices = @transform_1, window_bounds = array<i64: 32, 128>}, {pipeline_mode = #tpu.pipeline_mode<synchronous>, transform_indices = @transform_2, window_bounds = array<i64: 1, 128>}, {pipeline_mode = #tpu.pipeline_mode<synchronous>, transform_indices = @transform_3, window_bounds = array<i64: 128, 128>}, {pipeline_mode = #tpu.pipeline_mode<synchronous>, transform_indices = @transform_4, window_bounds = array<i64: 1, 128>}, {pipeline_mode = #tpu.pipeline_mode<synchronous>, transform_indices = @transform_5, window_bounds = array<i64: 2, 1>}, {pipeline_mode = #tpu.pipeline_mode<synchronous>, transform_indices = @transform_6, window_bounds = array<i64: 2, 128>}, {pipeline_mode = #tpu.pipeline_mode<synchronous>, transform_indices = @transform_7, window_bounds = array<i64: 1, 128>}]} {
    %c0_i32 = arith.constant 0 : i32
    %0 = arith.cmpi eq, %arg0, %c0_i32 : i32
    %1 = arith.extui %0 : i1 to i32
    %c0_i32_0 = arith.constant 0 : i32
    %2 = arith.cmpi ne, %1, %c0_i32_0 : i32
    scf.if %2 {
      %cst_24 = arith.constant 0.000000e+00 : f32
      %32 = vector.broadcast %cst_24 : f32 to vector<2x128xf32>
      %c0_25 = arith.constant 0 : index
      %c0_26 = arith.constant 0 : index
      %33 = vector.load %arg9[%c0_25, %c0_26] : memref<2x128xf32, #tpu.memory_space<vmem>>, vector<2x128xf32>
      tpu.vector_store %arg9[%c0_25, %c0_26], %32 {strides = array<i32>} : memref<2x128xf32, #tpu.memory_space<vmem>>, vector<2x128xf32>,
    } else {
    }
    %c0 = arith.constant 0 : index
    %c0_1 = arith.constant 0 : index
    %c0_2 = arith.constant 0 : index
    %3 = vector.load %arg1[%c0, %c0_1, %c0_2] : memref<2x256x32xbf16, #tpu.memory_space<vmem>>, vector<1x256x32xbf16>
    %4 = vector.shape_cast %3 : vector<1x256x32xbf16> to vector<256x32xbf16>
    %c0_3 = arith.constant 0 : index
    %c0_4 = arith.constant 0 : index
    %5 = vector.load %arg2[%c0_3, %c0_4] : memref<32x128xbf16, #tpu.memory_space<vmem>>, vector<32x128xbf16>
    %cst = arith.constant dense<0.000000e+00> : vector<256x128xf32>
    %6 = tpu.matmul %4, %5, %cst {dimension_numbers = #tpu.dot_dimension_numbers<[1], [0], [0], [1], [0, 0, 1, 1], [], []>} : vector<256x32xbf16>, vector<32x128xbf16>, vector<256x128xf32> -> vector<256x128xf32>
    %c0_5 = arith.constant 0 : index
    %c0_6 = arith.constant 0 : index
    %7 = vector.load %arg3[%c0_5, %c0_6] : memref<1x128xf32, #tpu.memory_space<vmem>>, vector<1x128xf32>
    %8 = vector.broadcast %7 : vector<1x128xf32> to vector<256x128xf32>
    %9 = arith.addf %6, %8 : vector<256x128xf32>
    %cst_7 = arith.constant 0.000000e+00 : f32
    %10 = vector.broadcast %cst_7 : f32 to vector<256x128xf32>
    %11 = arith.maximumf %9, %10 : vector<256x128xf32>
    %cst_8 = arith.constant dense<0.000000e+00> : vector<128xf32>
    %12 = vector.multi_reduction <add>, %11, %cst_8 [0] : vector<256x128xf32> to vector<128xf32>
    %13 = vector.shape_cast %12 : vector<128xf32> to vector<1x128xf32>
    %c1 = arith.constant 1 : index
    %c0_9 = arith.constant 0 : index
    %c0_10 = arith.constant 0 : index
    %14 = vector.load %arg1[%c1, %c0_9, %c0_10] : memref<2x256x32xbf16, #tpu.memory_space<vmem>>, vector<1x256x32xbf16>
    %15 = vector.shape_cast %14 : vector<1x256x32xbf16> to vector<256x32xbf16>
    %c0_11 = arith.constant 0 : index
    %c0_12 = arith.constant 0 : index
    %16 = vector.load %arg2[%c0_11, %c0_12] : memref<32x128xbf16, #tpu.memory_space<vmem>>, vector<32x128xbf16>
    %cst_13 = arith.constant dense<0.000000e+00> : vector<256x128xf32>
    %17 = tpu.matmul %15, %16, %cst_13 {dimension_numbers = #tpu.dot_dimension_numbers<[1], [0], [0], [1], [0, 0, 1, 1], [], []>} : vector<256x32xbf16>, vector<32x128xbf16>, vector<256x128xf32> -> vector<256x128xf32>
    %c0_14 = arith.constant 0 : index
    %c0_15 = arith.constant 0 : index
    %18 = vector.load %arg3[%c0_14, %c0_15] : memref<1x128xf32, #tpu.memory_space<vmem>>, vector<1x128xf32>
    %19 = vector.broadcast %18 : vector<1x128xf32> to vector<256x128xf32>
    %20 = arith.addf %17, %19 : vector<256x128xf32>
    %cst_16 = arith.constant 0.000000e+00 : f32
    %21 = vector.broadcast %cst_16 : f32 to vector<256x128xf32>
    %22 = arith.maximumf %20, %21 : vector<256x128xf32>
    %cst_17 = arith.constant dense<0.000000e+00> : vector<128xf32>
    %23 = vector.multi_reduction <add>, %22, %cst_17 [0] : vector<256x128xf32> to vector<128xf32>
    %24 = vector.shape_cast %23 : vector<128xf32> to vector<1x128xf32>
    %c0_18 = arith.constant 0 : index
    %c0_19 = arith.constant 0 : index
    %25 = vector.load %arg9[%c0_18, %c0_19] : memref<2x128xf32, #tpu.memory_space<vmem>>, vector<2x128xf32>
    %26 = tpu.concatenate %13, %24 in 0 : vector<1x128xf32>, vector<1x128xf32> -> vector<2x128xf32>
    %27 = arith.addf %25, %26 : vector<2x128xf32>
    %c0_20 = arith.constant 0 : index
    %c0_21 = arith.constant 0 : index
    %28 = vector.load %arg9[%c0_20, %c0_21] : memref<2x128xf32, #tpu.memory_space<vmem>>, vector<2x128xf32>
    tpu.vector_store %arg9[%c0_20, %c0_21], %27 {strides = array<i32>} : memref<2x128xf32, #tpu.memory_space<vmem>>, vector<2x128xf32>,
    %c0_i32_22 = arith.constant 0 : i32
    %29 = arith.cmpi eq, %arg0, %c0_i32_22 : i32
    %30 = arith.extui %29 : i1 to i32
    %c0_i32_23 = arith.constant 0 : i32
    %31 = arith.cmpi ne, %30, %c0_i32_23 : i32
    scf.if %31 {
      %c0_24 = arith.constant 0 : index
      %c0_25 = arith.constant 0 : index
      %32 = vector.load %arg9[%c0_24, %c0_25] : memref<2x128xf32, #tpu.memory_space<vmem>>, vector<2x128xf32>
      %cst_26 = arith.constant 3.906250e-03 : f32
      %33 = vector.broadcast %cst_26 : f32 to vector<2x128xf32>
      %34 = arith.mulf %32, %33 : vector<2x128xf32>
      %35 = arith.truncf %34 : vector<2x128xf32> to vector<2x128xbf16>
      %c0_27 = arith.constant 0 : index
      %c0_28 = arith.constant 0 : index
      %36 = vector.load %arg4[%c0_27, %c0_28] : memref<128x128xbf16, #tpu.memory_space<vmem>>, vector<128x128xbf16>
      %cst_29 = arith.constant dense<0.000000e+00> : vector<2x128xf32>
      %37 = tpu.matmul %35, %36, %cst_29 {dimension_numbers = #tpu.dot_dimension_numbers<[1], [0], [0], [1], [0, 0, 1, 1], [], []>} : vector<2x128xbf16>, vector<128x128xbf16>, vector<2x128xf32> -> vector<2x128xf32>
      %c0_30 = arith.constant 0 : index
      %c0_31 = arith.constant 0 : index
      %38 = vector.load %arg5[%c0_30, %c0_31] : memref<1x128xf32, #tpu.memory_space<vmem>>, vector<1x128xf32>
      %39 = vector.broadcast %38 : vector<1x128xf32> to vector<2x128xf32>
      %40 = arith.addf %37, %39 : vector<2x128xf32>
      %c0_32 = arith.constant 0 : index
      %c0_33 = arith.constant 0 : index
      %41 = vector.load %arg7[%c0_32, %c0_33] : memref<2x128xf32, #tpu.memory_space<vmem>>, vector<2x128xf32>
      tpu.vector_store %arg7[%c0_32, %c0_33], %40 {strides = array<i32>} : memref<2x128xf32, #tpu.memory_space<vmem>>, vector<2x128xf32>,
      %42 = tpu.iota {dimensions = array<i32: 1>} : vector<2x128xi32>
      %c7_i32 = arith.constant 7 : i32
      %43 = vector.broadcast %c7_i32 : i32 to vector<2x128xi32>
      %44 = arith.cmpi slt, %42, %43 : vector<2x128xi32>
      %cst_34 = arith.constant -1.000000e+30 : f32
      %45 = vector.broadcast %cst_34 : f32 to vector<2x128xf32>
      %46 = arith.select %44, %40, %45 : vector<2x128xi1>, vector<2x128xf32>
      %cst_35 = arith.constant dense<0xFF800000> : vector<2xf32>
      %47 = vector.multi_reduction <maximumf>, %46, %cst_35 [1] : vector<2x128xf32> to vector<2xf32>
      %48 = vector.shape_cast %47 : vector<2xf32> to vector<2x1xf32>
      %49 = vector.broadcast %48 : vector<2x1xf32> to vector<2x128xf32>
      %50 = arith.subf %46, %49 : vector<2x128xf32>
      %51 = math.exp %50 : vector<2x128xf32>
      %cst_36 = arith.constant dense<0.000000e+00> : vector<2xf32>
      %52 = vector.multi_reduction <add>, %51, %cst_36 [1] : vector<2x128xf32> to vector<2xf32>
      %53 = vector.shape_cast %52 : vector<2xf32> to vector<2x1xf32>
      %54 = math.log %53 : vector<2x1xf32>
      %55 = arith.addf %54, %48 : vector<2x1xf32>
      %c0_37 = arith.constant 0 : index
      %c0_38 = arith.constant 0 : index
      %56 = vector.load %arg6[%c0_37, %c0_38] : memref<2x1xi32, #tpu.memory_space<vmem>>, vector<2x1xi32>
      %57 = vector.broadcast %56 : vector<2x1xi32> to vector<2x128xi32>
      %58 = arith.cmpi eq, %42, %57 : vector<2x128xi32>
      %59 = arith.extui %58 : vector<2x128xi1> to vector<2x128xi32>
      %60 = arith.sitofp %59 : vector<2x128xi32> to vector<2x128xf32>
      %61 = arith.mulf %40, %60 : vector<2x128xf32>
      %cst_39 = arith.constant dense<0.000000e+00> : vector<2xf32>
      %62 = vector.multi_reduction <add>, %61, %cst_39 [1] : vector<2x128xf32> to vector<2xf32>
      %63 = vector.shape_cast %62 : vector<2xf32> to vector<2x1xf32>
      %64 = arith.subf %55, %63 : vector<2x1xf32>
      %cst_40 = arith.constant dense<0.000000e+00> : vector<1xf32>
      %65 = vector.multi_reduction <add>, %64, %cst_40 [0] : vector<2x1xf32> to vector<1xf32>
      %66 = vector.shape_cast %65 : vector<1xf32> to vector<1x1xf32>
      %cst_41 = arith.constant 5.000000e-01 : f32
      %67 = vector.broadcast %cst_41 : f32 to vector<1x1xf32>
      %68 = arith.mulf %66, %67 : vector<1x1xf32>
      %69 = vector.shape_cast %68 : vector<1x1xf32> to vector<1x1xf32>
      %70 = vector.broadcast %69 : vector<1x1xf32> to vector<1x128xf32>
      %c0_42 = arith.constant 0 : index
      %c0_43 = arith.constant 0 : index
      %71 = vector.load %arg8[%c0_42, %c0_43] : memref<1x128xf32, #tpu.memory_space<vmem>>, vector<1x128xf32>
      tpu.vector_store %arg8[%c0_42, %c0_43], %70 {strides = array<i32>} : memref<1x128xf32, #tpu.memory_space<vmem>>, vector<1x128xf32>,
    } else {
    }
    return
  }
  func.func @transform_0(%arg0: i32) -> (i32, i32, i32) {
    %c0_i32 = arith.constant 0 : i32
    %c0_i32_0 = arith.constant 0 : i32
    %c0_i32_1 = arith.constant 0 : i32
    return %c0_i32, %arg0, %c0_i32_0 : i32, i32, i32
  }
  func.func @transform_1(%arg0: i32) -> (i32, i32) {
    %c0_i32 = arith.constant 0 : i32
    %c0_i32_0 = arith.constant 0 : i32
    %c0_i32_1 = arith.constant 0 : i32
    return %c0_i32, %c0_i32_0 : i32, i32
  }
  func.func @transform_2(%arg0: i32) -> (i32, i32) {
    %c0_i32 = arith.constant 0 : i32
    %c0_i32_0 = arith.constant 0 : i32
    %c0_i32_1 = arith.constant 0 : i32
    return %c0_i32, %c0_i32_0 : i32, i32
  }
  func.func @transform_3(%arg0: i32) -> (i32, i32) {
    %c0_i32 = arith.constant 0 : i32
    %c0_i32_0 = arith.constant 0 : i32
    %c0_i32_1 = arith.constant 0 : i32
    return %c0_i32, %c0_i32_0 : i32, i32
  }
  func.func @transform_4(%arg0: i32) -> (i32, i32) {
    %c0_i32 = arith.constant 0 : i32
    %c0_i32_0 = arith.constant 0 : i32
    %c0_i32_1 = arith.constant 0 : i32
    return %c0_i32, %c0_i32_0 : i32, i32
  }
  func.func @transform_5(%arg0: i32) -> (i32, i32) {
    %c0_i32 = arith.constant 0 : i32
    %c0_i32_0 = arith.constant 0 : i32
    %c0_i32_1 = arith.constant 0 : i32
    return %c0_i32, %c0_i32_0 : i32, i32
  }
  func.func @transform_6(%arg0: i32) -> (i32, i32) {
    %c0_i32 = arith.constant 0 : i32
    %c0_i32_0 = arith.constant 0 : i32
    %c0_i32_1 = arith.constant 0 : i32
    return %c0_i32, %c0_i32_0 : i32, i32
  }
  func.func @transform_7(%arg0: i32) -> (i32, i32) {
    %c0_i32 = arith.constant 0 : i32
    %c0_i32_0 = arith.constant 0 : i32
    %c0_i32_1 = arith.constant 0 : i32
    return %c0_i32, %c0_i32_0 : i32, i32
  }
}

</mosaic_0001>

<bundles_post_ra>
// kernel: crisis_vit_forward.1
= control target key start
LH: loop header
LB: loop body
LE: loop exit
PB: predicated region body
PF: predicated region fallthrough
CT: control target
= control target key end

     0   :  { %13 = vsyncpa [#allocation4], 0  ;;  %s1551_s0 = inlined_call_operand.vmem [shape: bf16[2,256,32], index: 0, kind: input, shape index: {}]   ;;  %s1552_s1 = inlined_call_operand.vmem [shape: bf16[32,128], index: 1, kind: input, shape index: {}]   ;;  %s1553_s2 = inlined_call_operand.vmem [shape: f32[1,128], index: 2, kind: input, shape index: {}]   ;;  %s1554_s3 = inlined_call_operand.vmem [shape: bf16[128,128], index: 3, kind: input, shape index: {}]   ;;  %s1555_s4 = inlined_call_operand.vmem [shape: f32[1,128], index: 4, kind: input, shape index: {}]   ;;  %s1556_s5 = inlined_call_operand.vmem [shape: s32[2,1], index: 5, kind: input, shape index: {}]   ;;  %s1557_s6 = inlined_call_operand.hbm [shape: f32[2,128], index: 6, kind: output, shape index: {0}]   ;;  %s1558_s7 = inlined_call_operand.hbm [shape: f32[1,128], index: 7, kind: output, shape index: {1}]  }
   0x1   :  { %v1104_v0 = vld [vmem:[%s1552_s1 + $0x8] sm:$0xff]  ;;  %v1103_v1 = vld [vmem:[%s1552_s1] sm:$0xff] }
   0x2   :  { %220 = vmatpush.bf16.msra.mxu0 %v1104_v0  ;;  %539 = vmatpush.bf16.msra.mxu1 %v1104_v0 }
   0x3   :  { %1129 = vmatpush.bf16.msra.mxu3 %v1104_v0  ;;  %1131 = vmatpush.bf16.msra.mxu2 %v1104_v0 }
   0x4   :  { %14 = vsyncpa [#allocation6], 0  ;;  %v1087_v2 = vld [vmem:[%s1551_s0] sm:$0xff]  ;;  %vm165_vm0 = vcmask 261120   ;;  %v1096_v4 = vld [vmem:[%s1551_s0 + $0x48] sm:$0xff]  ;;  %vm692_vm1 = vcmask 1040384  }
   0x5   :  { %v1105_v3 = vld [vmem:[%s1551_s0 + $0x80] sm:$0xff]  ;;  %v1114_v5 = vld [vmem:[%s1551_s0 + $0xc8] sm:$0xff]  ;;  %v1097_v8 = vld [vmem:[%s1551_s0 + $0x50] sm:$0xff]  ;;  %vm788_vm3 = vcmask 1041408   ;;  %s829_s16 = sshll.u32 %s1557_s6, 4  ;;  %s1198_s17 = smov [#allocation3]   ;;  %s830_s16 = int_to_ptr.hbm [resolvable:$true] %s829_s16 }
   0x6   :  { %221 = vmatpush.bf16.msra.mxu0 %v1103_v1  ;;  %540 = vmatpush.bf16.msra.mxu1 %v1103_v1  ;;  %v1088_v6 = vld [vmem:[%s1551_s0 + $0x8] sm:$0xff]  ;;  %v1115_v9 = vld [vmem:[%s1551_s0 + $0xd0] sm:$0xff]  ;;  %v1098_v12 = vld [vmem:[%s1551_s0 + $0x58] sm:$0xff]  ;;  %s1199_s6 = smov [#allocation5]   ;;  %s840_s21 = sshll.u32 %s1558_s7, 4  ;;  %s841_s21 = int_to_ptr.hbm [resolvable:$true] %s840_s21 }
   0x7   :  { %1130 = vmatpush.bf16.msra.mxu3 %v1103_v1  ;;  %1132 = vmatpush.bf16.msra.mxu2 %v1103_v1  ;;  %v1106_v7 = vld [vmem:[%s1551_s0 + $0x88] sm:$0xff]  ;;  %v1089_v10 = vld [vmem:[%s1551_s0 + $0x10] sm:$0xff]  ;;  %v1116_v13 = vld [vmem:[%s1551_s0 + $0xd8] sm:$0xff]  ;;  %s838_s18 = sshll.u32 %s1199_s6, 4  ;;  %s839_s18 = int_to_ptr.vmem [resolvable:$true] %s838_s18 }
   0x8   :  { %v1107_v11 = vld [vmem:[%s1551_s0 + $0x90] sm:$0xff]  ;;  %v1090_v14 = vld [vmem:[%s1551_s0 + $0x18] sm:$0xff]  ;;  %v1099_v16 = vld [vmem:[%s1551_s0 + $0x60] sm:$0xff] }
   0x9   :  { %926 = vmatmul.msk.bf16.vlgmr.msra.gmra.mxu0 %vm165_vm0, %v1087_v2  ;;  %1038 = vmatmul.msk.bf16.vlgmr.msra.gmra.mxu1 %vm165_vm0, %v1105_v3  ;;  %v1108_v15 = vld [vmem:[%s1551_s0 + $0x98] sm:$0xff]  ;;  %v1117_v17 = vld [vmem:[%s1551_s0 + $0xe0] sm:$0xff]  ;;  %v1100_v20 = vld [vmem:[%s1551_s0 + $0x68] sm:$0xff] }
   0xa   :  { %935 = vmatmul.msk.bf16.vlgmr.msra.gmra.mxu3 %vm165_vm0, %v1096_v4  ;;  %1047 = vmatmul.msk.bf16.vlgmr.msra.gmra.mxu2 %vm165_vm0, %v1114_v5  ;;  %v1091_v18 = vld [vmem:[%s1551_s0 + $0x20] sm:$0xff]  ;;  %v1118_v21 = vld [vmem:[%s1551_s0 + $0xe8] sm:$0xff]  ;;  %v1093_v24 = vld [vmem:[%s1551_s0 + $0x30] sm:$0xff] }
   0xb   :  { %v1109_v19 = vld [vmem:[%s1551_s0 + $0xa0] sm:$0xff]  ;;  %v1092_v22 = vld [vmem:[%s1551_s0 + $0x28] sm:$0xff]  ;;  %v1111_v25 = vld [vmem:[%s1551_s0 + $0xb0] sm:$0xff] }
   0xc   :  { %v1110_v23 = vld [vmem:[%s1551_s0 + $0xa8] sm:$0xff]  ;;  %v1101_v26 = vld [vmem:[%s1551_s0 + $0x70] sm:$0xff]  ;;  %v1094_v28 = vld [vmem:[%s1551_s0 + $0x38] sm:$0xff] }
   0xd   :  { %v1119_v27 = vld [vmem:[%s1551_s0 + $0xf0] sm:$0xff]  ;;  %v1112_v29 = vld [vmem:[%s1551_s0 + $0xb8] sm:$0xff]  ;;  %v1095_v32 = vld [vmem:[%s1551_s0 + $0x40] sm:$0xff] }
   0xe   :  { %v1102_v30 = vld [vmem:[%s1551_s0 + $0x78] sm:$0xff]  ;;  %v1113_v33 = vld [vmem:[%s1551_s0 + $0xc0] sm:$0xff] }
   0xf   :  { %v1120_v31 = vld [vmem:[%s1551_s0 + $0xf8] sm:$0xff]  ;;  %v1375_v36 = vld [vmem:[%s1553_s2] ss:$0 sm:$0xff] }
  0x19   :  { %927 = vmatmul.msk.bf16.gmra.mxu0 %vm165_vm0, %v1088_v6  ;;  %1039 = vmatmul.msk.bf16.gmra.mxu1 %vm165_vm0, %v1106_v7 }
  0x1a   :  { %936 = vmatmul.msk.bf16.gmra.mxu3 %vm165_vm0, %v1097_v8  ;;  %1048 = vmatmul.msk.bf16.gmra.mxu2 %vm165_vm0, %v1115_v9 }
  0x29   :  { %928 = vmatmul.msk.bf16.gmra.mxu0 %vm165_vm0, %v1089_v10  ;;  %1040 = vmatmul.msk.bf16.gmra.mxu1 %vm165_vm0, %v1107_v11 }
  0x2a   :  { %937 = vmatmul.msk.bf16.gmra.mxu3 %vm165_vm0, %v1098_v12  ;;  %1049 = vmatmul.msk.bf16.gmra.mxu2 %vm165_vm0, %v1116_v13 }
  0x39   :  { %929 = vmatmul.msk.bf16.gmra.mxu0 %vm165_vm0, %v1090_v14  ;;  %1041 = vmatmul.msk.bf16.gmra.mxu1 %vm165_vm0, %v1108_v15 }
  0x3a   :  { %938 = vmatmul.msk.bf16.gmra.mxu3 %vm165_vm0, %v1099_v16  ;;  %1050 = vmatmul.msk.bf16.gmra.mxu2 %vm165_vm0, %v1117_v17 }
  0x49   :  { %930 = vmatmul.msk.bf16.gmra.mxu0 %vm165_vm0, %v1091_v18  ;;  %1042 = vmatmul.msk.bf16.gmra.mxu1 %vm165_vm0, %v1109_v19 }
  0x4a   :  { %939 = vmatmul.msk.bf16.gmra.mxu3 %vm165_vm0, %v1100_v20  ;;  %1051 = vmatmul.msk.bf16.gmra.mxu2 %vm165_vm0, %v1118_v21 }
  0x59   :  { %931 = vmatmul.msk.bf16.gmra.mxu0 %vm165_vm0, %v1092_v22  ;;  %1043 = vmatmul.msk.bf16.gmra.mxu1 %vm165_vm0, %v1110_v23 }
  0x5a   :  { %940 = vmatmul.msk.bf16.gmra.mxu3 %vm165_vm0, %v1101_v26  ;;  %1052 = vmatmul.msk.bf16.gmra.mxu2 %vm165_vm0, %v1119_v27 }
  0x69   :  { %932 = vmatmul.msk.bf16.gmra.mxu0 %vm165_vm0, %v1093_v24  ;;  %1044 = vmatmul.msk.bf16.gmra.mxu1 %vm165_vm0, %v1111_v25 }
  0x6a   :  { %941 = vmatmul.msk.bf16.gmra.mxu3 %vm165_vm0, %v1102_v30  ;;  %1053 = vmatmul.msk.bf16.gmra.mxu2 %vm165_vm0, %v1120_v31  ;;  %v1128_v31 = vld [vmem:[%s1554_s3 + $0x38] sm:$0xff] }
  0x6b   :  { %770 = vmatpush.bf16.msrb.mxu2 %v1128_v31 }
  0x79   :  { %933 = vmatmul.msk.bf16.gmra.mxu0 %vm165_vm0, %v1094_v28  ;;  %1045 = vmatmul.msk.bf16.gmra.mxu1 %vm165_vm0, %v1112_v29 }
  0x86   :  { %v223_v34 = vpop.f32.mrf.mxu0  ;;  %v542_v35 = vpop.f32.mrf.mxu1 }
  0x87   :  { %v224_v37 = vadd.f32 %v1375_v36, %v223_v34  ;;  %v543_v38 = vadd.f32 %v1375_v36, %v542_v35 }
  0x89   :  { %934 = vmatmul.msk.bf16.gmra.mxu0 %vm165_vm0, %v1095_v32  ;;  %1046 = vmatmul.msk.bf16.gmra.mxu1 %vm165_vm0, %v1113_v33  ;;  %v303_v43 = vmax.f32 %v224_v37, 0.0  ;;  %v622_v44 = vmax.f32 %v543_v38, 0.0 }
  0x8d   :  { %v1387_v1 = vpop.f32.mrf.mxu3  ;;  %v1389_v2 = vpop.f32.mrf.mxu2 }
  0x8e   :  { %v225_v39 = vpop.f32.mrf.mxu0  ;;  %v544_v40 = vpop.f32.mrf.mxu1 }
  0x8f   :  { %v226_v41 = vadd.f32 %v1375_v36, %v225_v39  ;;  %v545_v42 = vadd.f32 %v1375_v36, %v544_v40 }
  0x91   :  { %v304_v45 = vmax.f32 %v226_v41, 0.0  ;;  %v623_v46 = vmax.f32 %v545_v42, 0.0  ;;  %v1127_v41 = vld [vmem:[%s1554_s3 + $0x30] sm:$0xff] }
  0x92   :  { %771 = vmatpush.bf16.msrb.mxu2 %v1127_v41 }
  0x93   :  { %v335_v47 = vadd.f32 %v304_v45, %v303_v43  ;;  %v654_v48 = vadd.f32 %v623_v46, %v622_v44 }
  0x95   :  { %v1393_v11 = vpop.f32.mrf.mxu3  ;;  %v1395_v12 = vpop.f32.mrf.mxu2 }
  0x96   :  { %v228_v49 = vpop.f32.mrf.mxu0  ;;  %v547_v50 = vpop.f32.mrf.mxu1 }
  0x97   :  { %v229_v51 = vadd.f32 %v1375_v36, %v228_v49  ;;  %v548_v52 = vadd.f32 %v1375_v36, %v547_v50 }
  0x99   :  { %v305_v53 = vmax.f32 %v229_v51, 0.0  ;;  %v624_v54 = vmax.f32 %v548_v52, 0.0 }
  0x9b   :  { %v336_v55 = vadd.f32 %v335_v47, %v305_v53  ;;  %v655_v56 = vadd.f32 %v654_v48, %v624_v54  ;;  %v1126_v48 = vld [vmem:[%s1554_s3 + $0x28] sm:$0xff] }
  0x9c   :  { %772 = vmatpush.bf16.msrb.mxu2 %v1126_v48 }
  0x9d   :  { %v1401_v25 = vpop.f32.mrf.mxu3  ;;  %v1403_v26 = vpop.f32.mrf.mxu2 }
  0x9e   :  { %v230_v57 = vpop.f32.mrf.mxu0  ;;  %v549_v58 = vpop.f32.mrf.mxu1 }
  0x9f   :  { %v231_v59 = vadd.f32 %v1375_v36, %v230_v57  ;;  %v550_v60 = vadd.f32 %v1375_v36, %v549_v58  ;;  %v1125_v57 = vld [vmem:[%s1554_s3 + $0x20] sm:$0xff] }
  0xa0   :  { %773 = vmatpush.bf16.msrb.mxu2 %v1125_v57 }
  0xa1   :  { %v306_v61 = vmax.f32 %v231_v59, 0.0  ;;  %v625_v62 = vmax.f32 %v550_v60, 0.0 }
  0xa3   :  { %v337_v63 = vadd.f32 %v336_v55, %v306_v61  ;;  %v656_v0 = vadd.f32 %v655_v56, %v625_v62 }
  0xa5   :  { %v1408_v34 = vpop.f32.mrf.mxu3  ;;  %v1410_v35 = vpop.f32.mrf.mxu2 }
  0xa6   :  { %v233_v3 = vpop.f32.mrf.mxu0  ;;  %v552_v4 = vpop.f32.mrf.mxu1 }
  0xa7   :  { %v234_v5 = vadd.f32 %v1375_v36, %v233_v3  ;;  %v553_v6 = vadd.f32 %v1375_v36, %v552_v4 }
  0xa9   :  { %v307_v7 = vmax.f32 %v234_v5, 0.0  ;;  %v626_v8 = vmax.f32 %v553_v6, 0.0 }
  0xab   :  { %v338_v9 = vadd.f32 %v337_v63, %v307_v7  ;;  %v657_v10 = vadd.f32 %v656_v0, %v626_v8 }
  0xad   :  { %v1412_v39 = vpop.f32.mrf.mxu3  ;;  %v1414_v40 = vpop.f32.mrf.mxu2 }
  0xae   :  { %v235_v13 = vpop.f32.mrf.mxu0  ;;  %v554_v14 = vpop.f32.mrf.mxu1 }
  0xaf   :  { %v236_v15 = vadd.f32 %v1375_v36, %v235_v13  ;;  %v555_v16 = vadd.f32 %v1375_v36, %v554_v14 }
  0xb1   :  { %v308_v17 = vmax.f32 %v236_v15, 0.0  ;;  %v627_v18 = vmax.f32 %v555_v16, 0.0 }
  0xb3   :  { %v339_v19 = vadd.f32 %v338_v9, %v308_v17  ;;  %v658_v20 = vadd.f32 %v657_v10, %v627_v18 }
  0xb5   :  { %v1419_v44 = vpop.f32.mrf.mxu3  ;;  %v1421_v45 = vpop.f32.mrf.mxu2 }
  0xb6   :  { %v238_v21 = vpop.f32.mrf.mxu0  ;;  %v557_v22 = vpop.f32.mrf.mxu1 }
  0xb7   :  { %v239_v23 = vadd.f32 %v1375_v36, %v238_v21  ;;  %v558_v24 = vadd.f32 %v1375_v36, %v557_v22 }
  0xb9   :  { %v309_v27 = vmax.f32 %v239_v23, 0.0  ;;  %v628_v28 = vmax.f32 %v558_v24, 0.0 }
  0xbb   :  { %v340_v29 = vadd.f32 %v339_v19, %v309_v27  ;;  %v659_v30 = vadd.f32 %v658_v20, %v628_v28 }
  0xbd   :  { %v1426_v51 = vpop.f32.mrf.mxu3  ;;  %v1428_v52 = vpop.f32.mrf.mxu2 }
  0xbe   :  { %v240_v32 = vpop.f32.mrf.mxu0  ;;  %v559_v33 = vpop.f32.mrf.mxu1 }
  0xbf   :  { %v241_v62 = vadd.f32 %v1375_v36, %v240_v32  ;;  %v560_v63 = vadd.f32 %v1375_v36, %v559_v33 }
  0xc1   :  { %v310_v6 = vmax.f32 %v241_v62, 0.0  ;;  %v629_v7 = vmax.f32 %v560_v63, 0.0 }
  0xc3   :  { %v341_v16 = vadd.f32 %v340_v29, %v310_v6  ;;  %v660_v17 = vadd.f32 %v659_v30, %v629_v7 }
  0xc5   :  { %v1430_v55 = vpop.f32.mrf.mxu3  ;;  %v1432_v56 = vpop.f32.mrf.mxu2 }
  0xc6   :  { %v243_v37 = vpop.f32.mrf.mxu0  ;;  %v562_v38 = vpop.f32.mrf.mxu1 }
  0xc7   :  { %v244_v4 = vadd.f32 %v1375_v36, %v243_v37  ;;  %v563_v5 = vadd.f32 %v1375_v36, %v562_v38 }
  0xc9   :  { %v311_v10 = vmax.f32 %v244_v4, 0.0  ;;  %v630_v13 = vmax.f32 %v563_v5, 0.0 }
  0xcb   :  { %v342_v28 = vadd.f32 %v341_v16, %v311_v10  ;;  %v661_v31 = vadd.f32 %v660_v17, %v630_v13 }
  0xcd   :  { %v1437_v60 = vpop.f32.mrf.mxu3  ;;  %v1439_v61 = vpop.f32.mrf.mxu2 }
  0xce   :  { %v245_v42 = vpop.f32.mrf.mxu0  ;;  %v564_v43 = vpop.f32.mrf.mxu1 }
  0xcf   :  { %v246_v8 = vadd.f32 %v1375_v36, %v245_v42  ;;  %v565_v9 = vadd.f32 %v1375_v36, %v564_v43 }
  0xd1   :  { %v312_v20 = vmax.f32 %v246_v8, 0.0  ;;  %v631_v21 = vmax.f32 %v565_v9, 0.0 }
  0xd3   :  { %v343_v30 = vadd.f32 %v342_v28, %v312_v20  ;;  %v662_v38 = vadd.f32 %v661_v31, %v631_v21  ;;  %v1124_v21 = vld [vmem:[%s1554_s3 + $0x18] sm:$0xff]  ;;  %v269_v28 = vadd.f32 %v1375_v36, %v1387_v1  ;;  %v588_v31 = vadd.f32 %v1375_v36, %v1389_v2 }
  0xd4   :  { %774 = vmatpush.bf16.msrb.mxu2 %v1124_v21  ;;  %v274_v2 = vadd.f32 %v1375_v36, %v1401_v25 }
  0xd5   :  { %v1449_v18 = vpop.f32.mrf.mxu3  ;;  %v1451_v19 = vpop.f32.mrf.mxu2 }
  0xd6   :  { %v248_v46 = vpop.f32.mrf.mxu0  ;;  %v567_v47 = vpop.f32.mrf.mxu1  ;;  %v323_v25 = vmax.f32 %v274_v2, 0.0 }
  0xd7   :  { %v249_v14 = vadd.f32 %v1375_v36, %v248_v46  ;;  %v568_v15 = vadd.f32 %v1375_v36, %v567_v47 }
  0xd9   :  { %v313_v32 = vmax.f32 %v249_v14, 0.0  ;;  %v632_v33 = vmax.f32 %v568_v15, 0.0 }
  0xdb   :  { %v344_v47 = vadd.f32 %v343_v30, %v313_v32  ;;  %v663_v48 = vadd.f32 %v662_v38, %v632_v33 }
  0xdd   :  { %v1463_v9 = vpop.f32.mrf.mxu3  ;;  %v1465_v10 = vpop.f32.mrf.mxu2 }
  0xde   :  { %v250_v49 = vpop.f32.mrf.mxu0  ;;  %v569_v50 = vpop.f32.mrf.mxu1 }
  0xdf   :  { %v251_v22 = vadd.f32 %v1375_v36, %v250_v49  ;;  %v570_v23 = vadd.f32 %v1375_v36, %v569_v50 }
  0xe1   :  { %v314_v41 = vmax.f32 %v251_v22, 0.0  ;;  %v633_v42 = vmax.f32 %v570_v23, 0.0 }
  0xe3   :  { %v345_v63 = vadd.f32 %v344_v47, %v314_v41  ;;  %v271_v41 = vadd.f32 %v1375_v36, %v1393_v11 }
  0xe5   :  { %v322_v11 = vmax.f32 %v271_v41, 0.0  ;;  %v610_v41 = vadd.f32 %v1375_v36, %v1451_v19 }
  0xe6   :  { %v253_v53 = vpop.f32.mrf.mxu0  ;;  %v572_v54 = vpop.f32.mrf.mxu1 }
  0xe7   :  { %v254_v37 = vadd.f32 %v1375_v36, %v253_v53  ;;  %v573_v29 = vadd.f32 %v1375_v36, %v572_v54  ;;  %v664_v53 = vadd.f32 %v663_v48, %v633_v42  ;;  %v590_v42 = vadd.f32 %v1375_v36, %v1395_v12 }
  0xe8   :  { %v593_v48 = vadd.f32 %v1375_v36, %v1403_v26  ;;  %v276_v12 = vadd.f32 %v1375_v36, %v1408_v34  ;;  %v279_v26 = vadd.f32 %v1375_v36, %v1412_v39  ;;  %v603_v39 = vadd.f32 %v1375_v36, %v1428_v52 }
  0xe9   :  { %v315_v49 = vmax.f32 %v254_v37, 0.0  ;;  %v634_v50 = vmax.f32 %v573_v29, 0.0  ;;  %v289_v52 = vadd.f32 %v1375_v36, %v1437_v60  ;;  %v1122_v60 = vld [vmem:[%s1554_s3 + $0x8] sm:$0xff] }
  0xea   :  { %v324_v34 = vmax.f32 %v276_v12, 0.0 }
  0xeb   :  { %v346_v8 = vadd.f32 %v345_v63, %v315_v49  ;;  %v295_v49 = vpop.f32.mrf.mxu3 }
  0xee   :  { %v255_v58 = vpop.f32.mrf.mxu0  ;;  %v574_v59 = vpop.f32.mrf.mxu1 }
  0xef   :  { %v256_v43 = vadd.f32 %v1375_v36, %v255_v58  ;;  %v575_v46 = vadd.f32 %v1375_v36, %v574_v59  ;;  %v665_v59 = vadd.f32 %v664_v53, %v634_v50  ;;  %v614_v50 = vpop.f32.mrf.mxu2 }
  0xf0   :  { %v615_v19 = vadd.f32 %v1375_v36, %v614_v50 }
  0xf1   :  { %v316_v5 = vmax.f32 %v256_v43, 0.0  ;;  %v635_v6 = vmax.f32 %v575_v46, 0.0 }
  0xf3   :  { %v347_v15 = vadd.f32 %v346_v8, %v316_v5  ;;  %v666_v16 = vadd.f32 %v665_v59, %v635_v6  ;;  %v598_v8 = vadd.f32 %v1375_v36, %v1414_v40 }
  0xf5   :  { %v644_v40 = vmax.f32 %v598_v8, 0.0 }
  0xf6   :  { %v258_v0 = vpop.f32.mrf.mxu0  ;;  %v577_v3 = vpop.f32.mrf.mxu1 }
  0xf7   :  { %v259_v57 = vadd.f32 %v1375_v36, %v258_v0  ;;  %v578_v62 = vadd.f32 %v1375_v36, %v577_v3 }
  0xf9   :  { %v317_v13 = vmax.f32 %v259_v57, 0.0  ;;  %v636_v0 = vmax.f32 %v578_v62, 0.0  ;;  %v321_v57 = vmax.f32 %v269_v28, 0.0  ;;  %v640_v62 = vmax.f32 %v588_v31, 0.0 }
  0xfb   :  { %v348_v22 = vadd.f32 %v347_v15, %v317_v13  ;;  %v667_v23 = vadd.f32 %v666_v16, %v636_v0  ;;  %v284_v16 = vadd.f32 %v1375_v36, %v1426_v51 }
  0xfd   :  { %v327_v51 = vmax.f32 %v284_v16, 0.0 }
  0xfe   :  { %v260_v24 = vpop.f32.mrf.mxu0  ;;  %v579_v27 = vpop.f32.mrf.mxu1 }
  0xff   :  { %v261_v7 = vadd.f32 %v1375_v36, %v260_v24  ;;  %v580_v58 = vadd.f32 %v1375_v36, %v579_v27 }
 0x101   :  { %v318_v17 = vmax.f32 %v261_v7, 0.0  ;;  %v637_v20 = vmax.f32 %v580_v58, 0.0  ;;  %v642_v7 = vmax.f32 %v593_v48, 0.0  ;;  %v1196_v58 = vmov 0.0  }
 0x102   :  { %32 = vst [vmem:[#allocation2] sm:$0x3] %v1196_v58  ;;  %v296_v48 = vadd.f32 %v1375_v36, %v295_v49 }
 0x103   :  { %v349_v37 = vadd.f32 %v348_v22, %v318_v17  ;;  %v668_v29 = vadd.f32 %v667_v23, %v637_v20  ;;  %v325_v17 = vmax.f32 %v279_v26, 0.0  ;;  %v286_v22 = vadd.f32 %v1375_v36, %v1430_v55  ;;  %v298_v23 = vpop.f32.mrf.mxu3  ;;  %v1123_v55 = vld [vmem:[%s1554_s3 + $0x10] sm:$0xff] }
 0x104   :  { %775 = vmatpush.bf16.msrb.mxu2 %v1123_v55  ;;  %v332_v50 = vmax.f32 %v296_v48, 0.0  ;;  %v1197_v55 = vmov 0  }
 0x105   :  { %1137 = vset.pattern.permute.xlu0 %v1197_v55 }
 0x106   :  { %v263_v4 = vpop.f32.mrf.mxu0  ;;  %v582_v54 = vpop.f32.mrf.mxu1 }
 0x107   :  { %v264_v3 = vadd.f32 %v1375_v36, %v263_v4  ;;  %v583_v14 = vadd.f32 %v1375_v36, %v582_v54  ;;  %v595_v4 = vadd.f32 %v1375_v36, %v1410_v35  ;;  %v641_v54 = vmax.f32 %v590_v42, 0.0 }
 0x108   :  { %v281_v35 = vadd.f32 %v1375_v36, %v1419_v44  ;;  %v605_v44 = vadd.f32 %v1375_v36, %v1432_v56  ;;  %v328_v56 = vmax.f32 %v286_v22, 0.0  ;;  %776 = vmatpush.bf16.msrb.mxu2 %v1122_v60 }
 0x109   :  { %v319_v24 = vmax.f32 %v264_v3, 0.0  ;;  %v638_v27 = vmax.f32 %v583_v14, 0.0  ;;  %v643_v0 = vmax.f32 %v595_v4, 0.0  ;;  %v600_v3 = vadd.f32 %v1375_v36, %v1421_v45  ;;  %v617_v45 = vpop.f32.mrf.mxu2 }
 0x10a   :  { %v618_v49 = vadd.f32 %v1375_v36, %v617_v45 }
 0x10b   :  { %v350_v43 = vadd.f32 %v349_v37, %v319_v24  ;;  %v669_v46 = vadd.f32 %v668_v29, %v638_v27  ;;  %v326_v24 = vmax.f32 %v281_v35, 0.0  ;;  %v645_v27 = vmax.f32 %v600_v3, 0.0 }
 0x10c   :  { %v652_v35 = vmax.f32 %v618_v49, 0.0 }
 0x10e   :  { %v265_v32 = vpop.f32.mrf.mxu0  ;;  %v584_v33 = vpop.f32.mrf.mxu1 }
 0x10f   :  { %v266_v30 = vadd.f32 %v1375_v36, %v265_v32  ;;  %v585_v38 = vadd.f32 %v1375_v36, %v584_v33  ;;  %v646_v32 = vmax.f32 %v603_v39, 0.0  ;;  %v608_v33 = vadd.f32 %v1375_v36, %v1439_v61 }
 0x110   :  { %v294_v61 = vadd.f32 %v1375_v36, %v1463_v9  ;;  %v1121_v9 = vld [vmem:[%s1554_s3] sm:$0xff] }
 0x111   :  { %v320_v1 = vmax.f32 %v266_v30, 0.0  ;;  %v639_v47 = vmax.f32 %v585_v38, 0.0  ;;  %v647_v30 = vmax.f32 %v605_v44, 0.0  ;;  %v291_v38 = vadd.f32 %v1375_v36, %v1449_v18  ;;  %v619_v4 = vpop.f32.mrf.mxu2  ;;  %777 = vmatpush.bf16.msrb.mxu2 %v1121_v9 }
 0x113   :  { %v351_v63 = vadd.f32 %v350_v43, %v320_v1  ;;  %v670_v53 = vadd.f32 %v669_v46, %v639_v47  ;;  %v613_v46 = vadd.f32 %v1375_v36, %v1465_v10  ;;  %v329_v1 = vmax.f32 %v289_v52, 0.0  ;;  %v300_v10 = vpop.f32.mrf.mxu3 }
 0x114   :  { %v648_v47 = vmax.f32 %v608_v33, 0.0  ;;  %v301_v8 = vadd.f32 %v1375_v36, %v300_v10 }
 0x115   :  { %v352_v5 = vadd.f32 %v351_v63, %v321_v57  ;;  %v671_v6 = vadd.f32 %v670_v53, %v640_v62  ;;  %v330_v57 = vmax.f32 %v291_v38, 0.0  ;;  %v649_v62 = vmax.f32 %v610_v41, 0.0  ;;  %v1139_v38 = vld [vmem:[%s1555_s4] ss:$0 sm:$0xff] }
 0x116   :  { %v650_v12 = vmax.f32 %v613_v46, 0.0  ;;  %v801_v46 = vld [vmem:[%s1556_s5] sm:$0x3]  ;;  %s827_s5 = sshll.u32 %s1198_s17, 4  ;;  %s828_s5 = int_to_ptr.vmem [resolvable:$true] %s827_s5 }
 0x117   :  { %v353_v59 = vadd.f32 %v352_v5, %v322_v11  ;;  %v672_v13 = vadd.f32 %v671_v6, %v641_v54  ;;  %v331_v11 = vmax.f32 %v294_v61, 0.0  ;;  %v299_v6 = vadd.f32 %v1375_v36, %v298_v23 }
 0x119   :  { %v354_v14 = vadd.f32 %v353_v59, %v323_v25  ;;  %v673_v15 = vadd.f32 %v672_v13, %v642_v7  ;;  %v651_v25 = vmax.f32 %v615_v19, 0.0  ;;  %v620_v59 = vadd.f32 %v1375_v36, %v619_v4 }
 0x11b   :  { %v355_v20 = vadd.f32 %v354_v14, %v324_v34  ;;  %v674_v21 = vadd.f32 %v673_v15, %v643_v0  ;;  %v333_v0 = vmax.f32 %v299_v6, 0.0  ;;  %v334_v15 = vmax.f32 %v301_v8, 0.0 }
 0x11c   :  { %v653_v16 = vmax.f32 %v620_v59, 0.0 }
 0x11d   :  { %v356_v28 = vadd.f32 %v355_v20, %v325_v17  ;;  %v675_v31 = vadd.f32 %v674_v21, %v644_v40 }
 0x11f   :  { %v357_v37 = vadd.f32 %v356_v28, %v326_v24  ;;  %v676_v29 = vadd.f32 %v675_v31, %v645_v27 }
 0x121   :  { %v358_v42 = vadd.f32 %v357_v37, %v327_v51  ;;  %v677_v43 = vadd.f32 %v676_v29, %v646_v32  ;;  %v691_v51 = vld [vmem:[#allocation2] sm:$0x3] }
 0x123   :  { %v359_v2 = vadd.f32 %v358_v42, %v328_v56  ;;  %v678_v18 = vadd.f32 %v677_v43, %v647_v30  ;;  %v784_v56 = vlaneseq }
 0x125   :  { %v360_v63 = vadd.f32 %v359_v2, %v329_v1  ;;  %v679_v53 = vadd.f32 %v678_v18, %v648_v47  ;;  %v785_v30 = vand.u32 127, %v784_v56 }
 0x127   :  { %v361_v54 = vadd.f32 %v360_v63, %v330_v57  ;;  %v680_v5 = vadd.f32 %v679_v53, %v649_v62  ;;  %vm786_vm2 = vcmp.lt.s32.totalorder %v785_v30, 7 }
 0x129   :  { %v362_v7 = vadd.f32 %v361_v54, %v331_v11  ;;  %v681_v26 = vadd.f32 %v680_v5, %v650_v12 }
 0x12b   :  { %v363_v13 = vadd.f32 %v362_v7, %v332_v50  ;;  %v682_v34 = vadd.f32 %v681_v26, %v651_v25 }
 0x12d   :  { %v364_v3 = vadd.f32 %v363_v13, %v333_v0  ;;  %v683_v14 = vadd.f32 %v682_v34, %v652_v35 }
 0x12f   :  { %v365_v39 = vadd.f32 %v364_v3, %v334_v15  ;;  %v684_v17 = vadd.f32 %v683_v14, %v653_v16 }
 0x131   :  { %v366_v40 = vrot.slane %v365_v39, 4  ;;  %v685_v20 = vrot.slane %v684_v17, 4 }
 0x133   :  { %v367_v21 = vadd.f32 %v366_v40, %v365_v39  ;;  %v686_v22 = vadd.f32 %v685_v20, %v684_v17 }
 0x135   :  { %v368_v44 = vrot.slane %v367_v21, 2  ;;  %v687_v23 = vrot.slane %v686_v22, 2 }
 0x137   :  { %v369_v45 = vadd.f32 %v368_v44, %v367_v21  ;;  %v688_v24 = vadd.f32 %v687_v23, %v686_v22 }
 0x139   :  { %v370_v36 = vrot.slane %v369_v45, 1  ;;  %v689_v27 = vrot.slane %v688_v24, 1 }
 0x13b   :  { %v371_v28 = vadd.f32 %v370_v36, %v369_v45  ;;  %v690_v31 = vadd.f32 %v689_v27, %v688_v24 }
 0x13d   :  { %v693_v32 = vsel %vm692_vm1, %v371_v28, %v690_v31 }
 0x13e   :  { %v694_v52 = vadd.f32 %v693_v32, %v691_v51 }
 0x140   :  { %695 = vst [vmem:[#allocation2] sm:$0x3] %v694_v52 }
 0x147   :  { %v699_v33 = vld [vmem:[#allocation2] sm:$0x3] }
 0x148   :  { %v700_v37 = vmul.f32 0.00390625, %v699_v33 }
 0x14a   :  { %v701_v29 = vpack.c.bf16 %v700_v37, %v700_v37 }
 0x14c   :  { %778 = vmatmul.bf16.vlgmr.msrb.gmra.mxu2 %v701_v29 }
 0x1cf   :  { %v779_v41 = vpop.f32.mrf.mxu2 }
 0x1d0   :  { %v780_v42 = vadd.f32 %v1139_v38, %v779_v41 }
 0x1d2   :  { %783 = vst [vmem:[#allocation3] sm:$0x3] %v780_v42  ;;  %v787_v43 = vsel %vm786_vm2, %v780_v42, -1e+30 }
 0x1d3   :  { %v789_v60 = vsel %vm788_vm3, %v787_v43, -inf  ;;  %832 = dma.vmem_to_hbm [thread:$0]  %s828_s5, 32, %s830_s16, [#allocation4]  }
 0x1d4   :  { %790 = vmax.xlane.f32.xlu0 %v789_v60 }
 0x1d7   :  { %v781_v61 = vpop.f32.mrf.mxu2 }
 0x1e8   :  { %803 = vperm.xlu0 %1137, %v801_v46  }
 0x247   :  { %v791_v1 = vpop.xlane.xlu0 %790 }
 0x248   :  { %v792_v47 = vsub.f32 %v787_v43, %v791_v1 }
 0x24a   :  { %v793_v2 = vmul.f32 1.442695, %v792_v47 }
 0x24c   :  { %1140 = vpow2.f32 %v793_v2 }
 0x252   :  { %v1141_v18 = vpop.eup %1140 }
 0x253   :  { %v795_v48 = vsel %vm788_vm3, %v1141_v18, 0.0 }
 0x254   :  { %796 = vadd.xlane.f32.xlu1 %v795_v48 }
 0x25a   :  { %v804_v19 = vpop.permute.xlu0 %803 }
 0x25b   :  { %vm805_vm4 = vcmp.eq.s32.totalorder %v785_v30, %v804_v19 }
 0x25c   :  { %v1086_v57 = vsel %vm805_vm4, 1.0, %v1196_v58 }
 0x25d   :  { %v808_v62 = vmul.f32 %v1086_v57, %v780_v42 }
 0x25f   :  { %v809_v63 = vsel %vm788_vm3, %v808_v62, 0.0 }
 0x260   :  { %810 = vadd.xlane.f32.xlu1 %v809_v63 }
 0x2c7   :  { %v797_v53 = vpop.xlane.xlu1 %796 }
 0x2c8   :  { %1142 = vlog2.f32 %v797_v53 }
 0x2ce   :  { %v1143_v9 = vpop.eup %1142 }
 0x2cf   :  { %v799_v11 = vmul.f32 0.6931472, %v1143_v9 }
 0x2d1   :  { %v800_v12 = vadd.f32 %v799_v11, %v791_v1 }
 0x2d3   :  { %v811_v10 = vpop.xlane.xlu1 %810 }
 0x2d4   :  { %v812_v58 = vsub.f32 %v800_v12, %v811_v10 }
 0x2d6   :  { %v813_v4 = vsel %vm788_vm3, %v812_v58, 0.0 }
 0x2d7   :  { %v814_v54 = vrot.slane %v813_v4, 4 }
 0x2d9   :  { %v815_v5 = vadd.f32 %v814_v54, %v813_v4 }
 0x2db   :  { %v816_v6 = vrot.slane %v815_v5, 2 }
 0x2dd   :  { %v817_v49 = vadd.f32 %v816_v6, %v815_v5 }
 0x2df   :  { %v818_v50 = vrot.slane %v817_v49, 1 }
 0x2e1   :  { %v819_v25 = vadd.f32 %v818_v50, %v817_v49 }
 0x2e3   :  { %v820_v7 = vmul.f32 0.5, %v819_v25 }
 0x2e5   :  { %821 = vst [vmem:[#allocation5] sm:$0x1] %v820_v7 }
 0x2e6   :  { %843 = dma.vmem_to_hbm [thread:$0]  %s839_s18, 16, %s841_s21, [#allocation6]  }
 0x2e7   :  { %1192 = dma.done.wait [#allocation4], 32  }
 0x2e8   :  { %1193 = vsyncadd [#allocation4], 4294967264 }
 0x2e9   :  { %1194 = dma.done.wait [#allocation6], 16  }
 0x2ea   :  { %1195 = vsyncadd [#allocation6], 4294967280 }
 0x2eb   :  { %852 = vsyncpa [#allocation4], 1 }
 0x2ec   :  { %853 = vsyncpa [#allocation6], 1 }

</bundles_post_ra>
